<compile_context>
chip_gen: v7x
topology: tpu7x:2x2x1
jax: 0.10.0
libtpu: 0.0.40
codegen_flags: <defaults>
</compile_context>

<pallas_src>
import functools

import jax
import jax.numpy as jnp
from jax.experimental import pallas as pl
from jax.experimental.pallas import tpu as pltpu

_MIB = 1024 * 1024
_TILE_BUDGET_BYTES = 20 * _MIB       # VMEM budget for the pipelined tile buffers


def _round_up(x, m):
    return ((x + m - 1) // m) * m


def _itemsize(dtype):
    return jnp.dtype(dtype).itemsize


def _maybe_pad_e(e):
    """Pad E to a lane multiple only when the store-byte overhead is <= 25%."""
    ep = _round_up(e, 128)
    return ep if ep * 4 <= 5 * e else e


def _choose_tile(total, vmem_max, mult, align):
    """Tile size along the parallel (grid) axis.

    Prefers: fitting the VMEM budget, >= 2 grid steps (so v7x's two
    TensorCores both get work), `mult`-sized tiles, and exact divisors of
    `total` so no ragged boundary block is needed.
    """
    total = max(int(total), 1)
    target = max(min(int(vmem_max), total), 1)
    if total >= 2 * mult:                      # enough work to split across 2 TCs
        target = min(target, -(-total // 2))   # ceil(total / 2)
    step = mult if target >= mult else (align if target >= align else 1)
    target = max((target // step) * step, 1)
    if target >= total:
        return total
    for cand in range(target, max(1, target // 2) - 1, -1):
        if total % cand == 0 and (cand % align == 0 or cand == total):
            return cand
    return target   # ragged final block; Pallas clamps boundary DMAs


def _vmem_limit(footprint_bytes):
    # Actual need + headroom; floor at the per-generation scoped default
    # (32 MiB), never blindly request v7x's entire 64 MiB.
    return max(32 * _MIB, int(1.25 * footprint_bytes) + 4 * _MIB)


# ---------------------------------------------------------------------------
# Fused kernel (4-D input): patch extraction + matmul + bias in one pass.
# ---------------------------------------------------------------------------
def _fused_patch_kernel(x_ref, w_ref, b_ref, o_ref, *, compute_dtype):
    # x_ref: (rg, ph, nW, pw*C)  raw input rows (input dtype, e.g. f32)
    # w_ref: (ph, pw*C, Eo)      per-kernel-row weight slices (compute dtype)
    # b_ref: (1, Eo)             bias (f32)
    # o_ref: (rg, nW, Eo)        output tile
    rg = x_ref.shape[0]
    ph = x_ref.shape[1]
    n_w = x_ref.shape[2]
    eo = o_ref.shape[-1]
    bias = jnp.broadcast_to(b_ref[...], (rg, eo)).astype(jnp.float32)
    for j in range(n_w):                       # static unroll over patch columns
        acc = bias
        for r in range(ph):                    # static unroll over kernel rows
            lhs = x_ref[:, r, j, :].astype(compute_dtype)      # (rg, pw*C)
            acc = acc + jnp.dot(lhs, w_ref[r],
                                preferred_element_type=jnp.float32)
        o_ref[:, j, :] = acc.astype(o_ref.dtype)


def _patch_embed_4d(x, weight, bias, patch_size, *, compute_dtype, out_dtype):
    B, H, W, C = x.shape
    ph, pw = patch_size
    E = weight.shape[0]
    nH, nW = H // ph, W // pw
    G = B * nH
    pwC = pw * C
    Eo = _maybe_pad_e(E)

    # Free (contiguous) reshape -- no HBM pass over the activations.
    xr = x.reshape(G, ph, nW, pwC)

    # Conv weight (E, C, ph, pw) -> (ph, pw*C, E); tiny, host-side.
    w3 = jnp.transpose(weight, (2, 3, 1, 0)).reshape(ph, pwC, E)
    w3 = w3.astype(compute_dtype)
    b2 = bias.astype(jnp.float32).reshape(1, E)
    if Eo != E:
        w3 = jnp.pad(w3, ((0, 0), (0, 0), (0, Eo - E)))
        b2 = jnp.pad(b2, ((0, 0), (0, Eo - E)))

    # VMEM footprint per row-group (with (8,128) tile padding), double-buffered.
    in_per_rg = ph * _round_up(nW, 8) * _round_up(pwC, 128) * _itemsize(x.dtype)
    out_per_rg = _round_up(nW, 8) * _round_up(Eo, 128) * _itemsize(out_dtype)
    acc_per_rg = nW * _round_up(Eo, 128) * 4            # live f32 accumulators
    fixed = 2 * (ph * _round_up(pwC, 8) * _round_up(Eo, 128) * _itemsize(compute_dtype)
                 + _round_up(Eo, 128) * 4)
    per_rg = 2 * (in_per_rg + out_per_rg) + acc_per_rg
    rg_max = max((_TILE_BUDGET_BYTES - fixed) // per_rg, 1)
    rg = _choose_tile(G, min(rg_max, 1024), mult=8, align=1)
    grid = pl.cdiv(G, rg)
    footprint = fixed + rg * per_rg

    kernel = functools.partial(_fused_patch_kernel, compute_dtype=compute_dtype)
    out = pl.pallas_call(
        kernel,
        out_shape=jax.ShapeDtypeStruct((G, nW, Eo), out_dtype),
        grid=(grid,),
        in_specs=[
            pl.BlockSpec((rg, ph, nW, pwC), lambda i: (i, 0, 0, 0)),
            pl.BlockSpec((ph, pwC, Eo), lambda i: (0, 0, 0)),
            pl.BlockSpec((1, Eo), lambda i: (0, 0)),
        ],
        out_specs=pl.BlockSpec((rg, nW, Eo), lambda i: (i, 0, 0)),
        compiler_params=pltpu.CompilerParams(
            dimension_semantics=("parallel",),
            vmem_limit_bytes=_vmem_limit(footprint),
        ),
        cost_estimate=pl.CostEstimate(
            flops=2 * G * nW * ph * pwC * Eo,
            transcendentals=0,
            bytes_accessed=(G * ph * nW * pwC * _itemsize(x.dtype)
                            + ph * pwC * Eo * _itemsize(compute_dtype)
                            + G * nW * Eo * _itemsize(out_dtype)),
        ),
    )(xr, w3, b2)

    if Eo != E:
        out = out[..., :E]
    return out.reshape(B, nH, nW, E)


# ---------------------------------------------------------------------------
# Plain matmul+bias kernel (used for the 5-D / time path after one transpose).
# ---------------------------------------------------------------------------
def _matmul_bias_kernel(p_ref, w_ref, b_ref, o_ref):
    # p_ref: (tm, K), w_ref: (K, Eo), b_ref: (1, Eo) f32, o_ref: (tm, Eo)
    acc = jnp.dot(p_ref[...], w_ref[...], preferred_element_type=jnp.float32)
    o_ref[...] = (acc + b_ref[...]).astype(o_ref.dtype)


def _patch_matmul(patches, w2d, b2d, *, out_dtype):
    M, K = patches.shape
    Eo = w2d.shape[1]

    in_per_row = _round_up(K, 128) * _itemsize(patches.dtype)
    out_per_row = _round_up(Eo, 128) * _itemsize(out_dtype)
    fixed = 2 * (_round_up(K, 8) * _round_up(Eo, 128) * _itemsize(w2d.dtype)
                 + _round_up(Eo, 128) * 4)
    per_row = 2 * (in_per_row + out_per_row)
    tm_max = max((_TILE_BUDGET_BYTES - fixed) // per_row, 8)
    tm = _choose_tile(M, min(tm_max, 1024), mult=16, align=8)
    grid = pl.cdiv(M, tm)
    footprint = fixed + tm * per_row

    return pl.pallas_call(
        _matmul_bias_kernel,
        out_shape=jax.ShapeDtypeStruct((M, Eo), out_dtype),
        grid=(grid,),
        in_specs=[
            pl.BlockSpec((tm, K), lambda i: (i, 0)),
            pl.BlockSpec((K, Eo), lambda i: (0, 0)),
            pl.BlockSpec((1, Eo), lambda i: (0, 0)),
        ],
        out_specs=pl.BlockSpec((tm, Eo), lambda i: (i, 0)),
        compiler_params=pltpu.CompilerParams(
            dimension_semantics=("parallel",),
            vmem_limit_bytes=_vmem_limit(footprint),
        ),
        cost_estimate=pl.CostEstimate(
            flops=2 * M * K * Eo,
            transcendentals=0,
            bytes_accessed=(M * K * _itemsize(patches.dtype)
                            + K * Eo * _itemsize(w2d.dtype)
                            + M * Eo * _itemsize(out_dtype)),
        ),
    )(patches, w2d, b2d)


def _patch_embed_5d(x, weight, bias, patch_size, *, compute_dtype, out_dtype):
    B, H, W, T, C = x.shape
    ph, pw = patch_size
    E = weight.shape[0]
    nH, nW = H // ph, W // pw
    K = ph * pw * C
    M = B * nH * nW * T
    Eo = _maybe_pad_e(E)

    # One transpose pass, ordered (B, nH, nW, T), so the output reshapes
    # directly to (B, nH, nW, T, E) and needs no output transpose.  The
    # compute-dtype cast fuses into this pass.
    # TODO(synk): fold this remaining transpose into the kernel too (the time
    #             axis sits between pw and C in memory, which would need
    #             per-(row, t) strided gathers in VMEM).
    p = x.reshape(B, nH, ph, nW, pw, T, C)
    p = jnp.transpose(p, (0, 1, 3, 5, 2, 4, 6))      # (B, nH, nW, T, ph, pw, C)
    patches = p.reshape(M, K).astype(compute_dtype)

    w2d = jnp.transpose(weight, (2, 3, 1, 0)).reshape(K, E).astype(compute_dtype)
    b2d = bias.astype(jnp.float32).reshape(1, E)
    if Eo != E:
        w2d = jnp.pad(w2d, ((0, 0), (0, Eo - E)))
        b2d = jnp.pad(b2d, ((0, 0), (0, Eo - E)))

    out = _patch_matmul(patches, w2d, b2d, out_dtype=out_dtype)
    if Eo != E:
        out = out[:, :E]
    return out.reshape(B, nH, nW, T, E)


def flexi_patch_embed(x, weight, bias, patch_size, *,
                      compute_dtype=jnp.bfloat16, out_dtype=None):
    """Forward pass of FlexiPatchEmbed with the base patch size.

    x:      (B, H, W, C) or (B, H, W, T, C)
    weight: (E, C, P, P)  -- PyTorch Conv2d weight layout
    bias:   (E,)
    Returns (B, H//P, W//P, E) or (B, H//P, W//P, T, E).

    compute_dtype: MXU operand dtype (bf16 default, f32 accumulation; pass
                   jnp.float32 for f32-exact embeddings).
    out_dtype:     output dtype (default: x.dtype; bf16 halves output HBM
                   traffic when the consumer accepts it).
    """
    ph, pw = patch_size
    E, C = weight.shape[0], weight.shape[1]
    out_dtype = x.dtype if out_dtype is None else out_dtype
    compute_dtype = x.dtype if compute_dtype is None else compute_dtype

    if x.ndim == 5:
        _, H, W, _, Cin = x.shape
    else:
        _, H, W, Cin = x.shape
    assert Cin == C and H % ph == 0 and W % pw == 0

    # TODO(synk): resize_patch_embed (bicubic+antialias pinv weight resizing)
    #             is not implemented; only the base-patch-size path is done.
    if x.ndim == 5:
        out = _patch_embed_5d(x, weight, bias, (ph, pw),
                              compute_dtype=compute_dtype, out_dtype=out_dtype)
    else:
        out = _patch_embed_4d(x, weight, bias, (ph, pw),
                              compute_dtype=compute_dtype, out_dtype=out_dtype)
    # norm_layer=None -> Identity
    return out


def _reference(x, weight, bias, patch_size):
    """Pure-JAX reference via lax.conv_general_dilated (NCHW, like PyTorch)."""
    ph, pw = patch_size
    x_nchw = jnp.transpose(x, (0, 3, 1, 2))
    y = jax.lax.conv_general_dilated(
        x_nchw, weight, window_strides=(ph, pw), padding="VALID",
        dimension_numbers=("NCHW", "OIHW", "NCHW"))
    y = y + bias.reshape(1, -1, 1, 1)
    return jnp.transpose(y, (0, 2, 3, 1))


if __name__ == "__main__":
    key = jax.random.PRNGKey(0)
    kx, kw, kb, kt = jax.random.split(key, 4)

    B, H, W, C = 2, 16, 16, 4
    P = 4                      # base patch size
    E = 32                     # embed_dim

    x = jax.random.normal(kx, (B, H, W, C), dtype=jnp.float32)
    weight = jax.random.normal(kw, (E, C, P, P), dtype=jnp.float32) * 0.02
    bias = jax.random.normal(kb, (E,), dtype=jnp.float32) * 0.01

    ref = _reference(x, weight, bias, (P, P))

    # f32 compute path: tight check of the fused extraction + matmul.
    out_f32 = jax.block_until_ready(
        flexi_patch_embed(x, weight, bias, (P, P), compute_dtype=jnp.float32))
    assert out_f32.shape == (B, H // P, W // P, E), out_f32.shape
    assert jnp.allclose(out_f32, ref, atol=5e-3, rtol=5e-3), \
        float(jnp.max(jnp.abs(out_f32 - ref)))

    # Default bf16-operand path (f32 accumulation): looser tolerance.
    out_bf16 = jax.block_until_ready(flexi_patch_embed(x, weight, bias, (P, P)))
    assert out_bf16.shape == (B, H // P, W // P, E), out_bf16.shape
    assert jnp.allclose(out_bf16, ref, atol=2e-2, rtol=2e-2), \
        float(jnp.max(jnp.abs(out_bf16 - ref)))

    # 5-D (time) path: (B, H, W, T, C) -> (B, H//P, W//P, T, E).
    T = 3
    xt = jax.random.normal(kt, (B, H, W, T, C), dtype=jnp.float32)
    out_t = jax.block_until_ready(flexi_patch_embed(xt, weight, bias, (P, P)))
    xt4 = jnp.transpose(xt, (0, 3, 1, 2, 4)).reshape(B * T, H, W, C)
    ref_t = _reference(xt4, weight, bias, (P, P)).reshape(B, T, H // P, W // P, E)
    ref_t = jnp.transpose(ref_t, (0, 2, 3, 1, 4))
    assert out_t.shape == (B, H // P, W // P, T, E), out_t.shape
    assert jnp.allclose(out_t, ref_t, atol=2e-2, rtol=2e-2), \
        float(jnp.max(jnp.abs(out_t - ref_t)))

    print("KERNEL_OK")
</pallas_src>

<mosaic_0001>
module attributes {stable_mosaic.version = 11 : i64} {
  func.func @_fused_patch_kernel(%arg0: i32, %arg1: memref<8x4x4x16xf32, #tpu.memory_space<vmem>>, %arg2: memref<4x16x32xf32, #tpu.memory_space<vmem>>, %arg3: memref<1x32xf32, #tpu.memory_space<vmem>>, %arg4: memref<8x4x32xf32, #tpu.memory_space<vmem>>) attributes {dimension_semantics = [#tpu.dimension_semantics<parallel>], iteration_bounds = array<i64: 1>, scalar_prefetch = 0 : i64, scratch_operands = 0 : i64, tpu.core_type = #tpu.core_type<tc>, window_params = [{transform_indices = @transform_0, window_bounds = array<i64: 8, 4, 4, 16>}, {pipeline_mode = #tpu.pipeline_mode<synchronous>, transform_indices = @transform_1, window_bounds = array<i64: 4, 16, 32>}, {pipeline_mode = #tpu.pipeline_mode<synchronous>, transform_indices = @transform_2, window_bounds = array<i64: 1, 32>}, {transform_indices = @transform_3, window_bounds = array<i64: 8, 4, 32>}]} {
    %c0 = arith.constant 0 : index
    %c0_0 = arith.constant 0 : index
    %0 = vector.load %arg3[%c0, %c0_0] : memref<1x32xf32, #tpu.memory_space<vmem>>, vector<1x32xf32>
    %1 = vector.shape_cast %0 : vector<1x32xf32> to vector<1x32xf32>
    %2 = vector.broadcast %1 : vector<1x32xf32> to vector<8x32xf32>
    %c0_1 = arith.constant 0 : index
    %c0_2 = arith.constant 0 : index
    %c0_3 = arith.constant 0 : index
    %c0_4 = arith.constant 0 : index
    %3 = vector.load %arg1[%c0_1, %c0_2, %c0_3, %c0_4] : memref<8x4x4x16xf32, #tpu.memory_space<vmem>>, vector<8x1x1x16xf32>
    %4 = vector.shape_cast %3 : vector<8x1x1x16xf32> to vector<8x16xf32>
    %c0_5 = arith.constant 0 : index
    %c0_6 = arith.constant 0 : index
    %c0_7 = arith.constant 0 : index
    %5 = vector.load %arg2[%c0_5, %c0_6, %c0_7] : memref<4x16x32xf32, #tpu.memory_space<vmem>>, vector<1x16x32xf32>
    %6 = vector.shape_cast %5 : vector<1x16x32xf32> to vector<16x32xf32>
    %cst = arith.constant dense<0.000000e+00> : vector<8x32xf32>
    %7 = tpu.matmul %4, %6, %cst {dimension_numbers = #tpu.dot_dimension_numbers<[1], [0], [0], [1], [0, 0, 1, 1], [], []>} : vector<8x16xf32>, vector<16x32xf32>, vector<8x32xf32> -> vector<8x32xf32>
    %8 = arith.addf %2, %7 : vector<8x32xf32>
    %c0_8 = arith.constant 0 : index
    %c1 = arith.constant 1 : index
    %c0_9 = arith.constant 0 : index
    %c0_10 = arith.constant 0 : index
    %9 = vector.load %arg1[%c0_8, %c1, %c0_9, %c0_10] : memref<8x4x4x16xf32, #tpu.memory_space<vmem>>, vector<8x1x1x16xf32>
    %10 = vector.shape_cast %9 : vector<8x1x1x16xf32> to vector<8x16xf32>
    %c1_11 = arith.constant 1 : index
    %c0_12 = arith.constant 0 : index
    %c0_13 = arith.constant 0 : index
    %11 = vector.load %arg2[%c1_11, %c0_12, %c0_13] : memref<4x16x32xf32, #tpu.memory_space<vmem>>, vector<1x16x32xf32>
    %12 = vector.shape_cast %11 : vector<1x16x32xf32> to vector<16x32xf32>
    %cst_14 = arith.constant dense<0.000000e+00> : vector<8x32xf32>
    %13 = tpu.matmul %10, %12, %cst_14 {dimension_numbers = #tpu.dot_dimension_numbers<[1], [0], [0], [1], [0, 0, 1, 1], [], []>} : vector<8x16xf32>, vector<16x32xf32>, vector<8x32xf32> -> vector<8x32xf32>
    %14 = arith.addf %8, %13 : vector<8x32xf32>
    %c0_15 = arith.constant 0 : index
    %c2 = arith.constant 2 : index
    %c0_16 = arith.constant 0 : index
    %c0_17 = arith.constant 0 : index
    %15 = vector.load %arg1[%c0_15, %c2, %c0_16, %c0_17] : memref<8x4x4x16xf32, #tpu.memory_space<vmem>>, vector<8x1x1x16xf32>
    %16 = vector.shape_cast %15 : vector<8x1x1x16xf32> to vector<8x16xf32>
    %c2_18 = arith.constant 2 : index
    %c0_19 = arith.constant 0 : index
    %c0_20 = arith.constant 0 : index
    %17 = vector.load %arg2[%c2_18, %c0_19, %c0_20] : memref<4x16x32xf32, #tpu.memory_space<vmem>>, vector<1x16x32xf32>
    %18 = vector.shape_cast %17 : vector<1x16x32xf32> to vector<16x32xf32>
    %cst_21 = arith.constant dense<0.000000e+00> : vector<8x32xf32>
    %19 = tpu.matmul %16, %18, %cst_21 {dimension_numbers = #tpu.dot_dimension_numbers<[1], [0], [0], [1], [0, 0, 1, 1], [], []>} : vector<8x16xf32>, vector<16x32xf32>, vector<8x32xf32> -> vector<8x32xf32>
    %20 = arith.addf %14, %19 : vector<8x32xf32>
    %c0_22 = arith.constant 0 : index
    %c3 = arith.constant 3 : index
    %c0_23 = arith.constant 0 : index
    %c0_24 = arith.constant 0 : index
    %21 = vector.load %arg1[%c0_22, %c3, %c0_23, %c0_24] : memref<8x4x4x16xf32, #tpu.memory_space<vmem>>, vector<8x1x1x16xf32>
    %22 = vector.shape_cast %21 : vector<8x1x1x16xf32> to vector<8x16xf32>
    %c3_25 = arith.constant 3 : index
    %c0_26 = arith.constant 0 : index
    %c0_27 = arith.constant 0 : index
    %23 = vector.load %arg2[%c3_25, %c0_26, %c0_27] : memref<4x16x32xf32, #tpu.memory_space<vmem>>, vector<1x16x32xf32>
    %24 = vector.shape_cast %23 : vector<1x16x32xf32> to vector<16x32xf32>
    %cst_28 = arith.constant dense<0.000000e+00> : vector<8x32xf32>
    %25 = tpu.matmul %22, %24, %cst_28 {dimension_numbers = #tpu.dot_dimension_numbers<[1], [0], [0], [1], [0, 0, 1, 1], [], []>} : vector<8x16xf32>, vector<16x32xf32>, vector<8x32xf32> -> vector<8x32xf32>
    %26 = arith.addf %20, %25 : vector<8x32xf32>
    %c0_29 = arith.constant 0 : index
    %c0_30 = arith.constant 0 : index
    %c0_31 = arith.constant 0 : index
    %27 = vector.load %arg4[%c0_29, %c0_30, %c0_31] : memref<8x4x32xf32, #tpu.memory_space<vmem>>, vector<8x1x32xf32>
    %28 = vector.shape_cast %27 : vector<8x1x32xf32> to vector<8x32xf32>
    %29 = vector.shape_cast %26 : vector<8x32xf32> to vector<8x1x32xf32>
    tpu.vector_store %arg4[%c0_29, %c0_30, %c0_31], %29 {strides = array<i32>} : memref<8x4x32xf32, #tpu.memory_space<vmem>>, vector<8x1x32xf32>,
    %c0_32 = arith.constant 0 : index
    %c0_33 = arith.constant 0 : index
    %c1_34 = arith.constant 1 : index
    %c0_35 = arith.constant 0 : index
    %30 = vector.load %arg1[%c0_32, %c0_33, %c1_34, %c0_35] : memref<8x4x4x16xf32, #tpu.memory_space<vmem>>, vector<8x1x1x16xf32>
    %31 = vector.shape_cast %30 : vector<8x1x1x16xf32> to vector<8x16xf32>
    %c0_36 = arith.constant 0 : index
    %c0_37 = arith.constant 0 : index
    %c0_38 = arith.constant 0 : index
    %32 = vector.load %arg2[%c0_36, %c0_37, %c0_38] : memref<4x16x32xf32, #tpu.memory_space<vmem>>, vector<1x16x32xf32>
    %33 = vector.shape_cast %32 : vector<1x16x32xf32> to vector<16x32xf32>
    %cst_39 = arith.constant dense<0.000000e+00> : vector<8x32xf32>
    %34 = tpu.matmul %31, %33, %cst_39 {dimension_numbers = #tpu.dot_dimension_numbers<[1], [0], [0], [1], [0, 0, 1, 1], [], []>} : vector<8x16xf32>, vector<16x32xf32>, vector<8x32xf32> -> vector<8x32xf32>
    %35 = arith.addf %2, %34 : vector<8x32xf32>
    %c0_40 = arith.constant 0 : index
    %c1_41 = arith.constant 1 : index
    %c1_42 = arith.constant 1 : index
    %c0_43 = arith.constant 0 : index
    %36 = vector.load %arg1[%c0_40, %c1_41, %c1_42, %c0_43] : memref<8x4x4x16xf32, #tpu.memory_space<vmem>>, vector<8x1x1x16xf32>
    %37 = vector.shape_cast %36 : vector<8x1x1x16xf32> to vector<8x16xf32>
    %c1_44 = arith.constant 1 : index
    %c0_45 = arith.constant 0 : index
    %c0_46 = arith.constant 0 : index
    %38 = vector.load %arg2[%c1_44, %c0_45, %c0_46] : memref<4x16x32xf32, #tpu.memory_space<vmem>>, vector<1x16x32xf32>
    %39 = vector.shape_cast %38 : vector<1x16x32xf32> to vector<16x32xf32>
    %cst_47 = arith.constant dense<0.000000e+00> : vector<8x32xf32>
    %40 = tpu.matmul %37, %39, %cst_47 {dimension_numbers = #tpu.dot_dimension_numbers<[1], [0], [0], [1], [0, 0, 1, 1], [], []>} : vector<8x16xf32>, vector<16x32xf32>, vector<8x32xf32> -> vector<8x32xf32>
    %41 = arith.addf %35, %40 : vector<8x32xf32>
    %c0_48 = arith.constant 0 : index
    %c2_49 = arith.constant 2 : index
    %c1_50 = arith.constant 1 : index
    %c0_51 = arith.constant 0 : index
    %42 = vector.load %arg1[%c0_48, %c2_49, %c1_50, %c0_51] : memref<8x4x4x16xf32, #tpu.memory_space<vmem>>, vector<8x1x1x16xf32>
    %43 = vector.shape_cast %42 : vector<8x1x1x16xf32> to vector<8x16xf32>
    %c2_52 = arith.constant 2 : index
    %c0_53 = arith.constant 0 : index
    %c0_54 = arith.constant 0 : index
    %44 = vector.load %arg2[%c2_52, %c0_53, %c0_54] : memref<4x16x32xf32, #tpu.memory_space<vmem>>, vector<1x16x32xf32>
    %45 = vector.shape_cast %44 : vector<1x16x32xf32> to vector<16x32xf32>
    %cst_55 = arith.constant dense<0.000000e+00> : vector<8x32xf32>
    %46 = tpu.matmul %43, %45, %cst_55 {dimension_numbers = #tpu.dot_dimension_numbers<[1], [0], [0], [1], [0, 0, 1, 1], [], []>} : vector<8x16xf32>, vector<16x32xf32>, vector<8x32xf32> -> vector<8x32xf32>
    %47 = arith.addf %41, %46 : vector<8x32xf32>
    %c0_56 = arith.constant 0 : index
    %c3_57 = arith.constant 3 : index
    %c1_58 = arith.constant 1 : index
    %c0_59 = arith.constant 0 : index
    %48 = vector.load %arg1[%c0_56, %c3_57, %c1_58, %c0_59] : memref<8x4x4x16xf32, #tpu.memory_space<vmem>>, vector<8x1x1x16xf32>
    %49 = vector.shape_cast %48 : vector<8x1x1x16xf32> to vector<8x16xf32>
    %c3_60 = arith.constant 3 : index
    %c0_61 = arith.constant 0 : index
    %c0_62 = arith.constant 0 : index
    %50 = vector.load %arg2[%c3_60, %c0_61, %c0_62] : memref<4x16x32xf32, #tpu.memory_space<vmem>>, vector<1x16x32xf32>
    %51 = vector.shape_cast %50 : vector<1x16x32xf32> to vector<16x32xf32>
    %cst_63 = arith.constant dense<0.000000e+00> : vector<8x32xf32>
    %52 = tpu.matmul %49, %51, %cst_63 {dimension_numbers = #tpu.dot_dimension_numbers<[1], [0], [0], [1], [0, 0, 1, 1], [], []>} : vector<8x16xf32>, vector<16x32xf32>, vector<8x32xf32> -> vector<8x32xf32>
    %53 = arith.addf %47, %52 : vector<8x32xf32>
    %c0_64 = arith.constant 0 : index
    %c1_65 = arith.constant 1 : index
    %c0_66 = arith.constant 0 : index
    %54 = vector.load %arg4[%c0_64, %c1_65, %c0_66] : memref<8x4x32xf32, #tpu.memory_space<vmem>>, vector<8x1x32xf32>
    %55 = vector.shape_cast %54 : vector<8x1x32xf32> to vector<8x32xf32>
    %56 = vector.shape_cast %53 : vector<8x32xf32> to vector<8x1x32xf32>
    tpu.vector_store %arg4[%c0_64, %c1_65, %c0_66], %56 {strides = array<i32>} : memref<8x4x32xf32, #tpu.memory_space<vmem>>, vector<8x1x32xf32>,
    %c0_67 = arith.constant 0 : index
    %c0_68 = arith.constant 0 : index
    %c2_69 = arith.constant 2 : index
    %c0_70 = arith.constant 0 : index
    %57 = vector.load %arg1[%c0_67, %c0_68, %c2_69, %c0_70] : memref<8x4x4x16xf32, #tpu.memory_space<vmem>>, vector<8x1x1x16xf32>
    %58 = vector.shape_cast %57 : vector<8x1x1x16xf32> to vector<8x16xf32>
    %c0_71 = arith.constant 0 : index
    %c0_72 = arith.constant 0 : index
    %c0_73 = arith.constant 0 : index
    %59 = vector.load %arg2[%c0_71, %c0_72, %c0_73] : memref<4x16x32xf32, #tpu.memory_space<vmem>>, vector<1x16x32xf32>
    %60 = vector.shape_cast %59 : vector<1x16x32xf32> to vector<16x32xf32>
    %cst_74 = arith.constant dense<0.000000e+00> : vector<8x32xf32>
    %61 = tpu.matmul %58, %60, %cst_74 {dimension_numbers = #tpu.dot_dimension_numbers<[1], [0], [0], [1], [0, 0, 1, 1], [], []>} : vector<8x16xf32>, vector<16x32xf32>, vector<8x32xf32> -> vector<8x32xf32>
    %62 = arith.addf %2, %61 : vector<8x32xf32>
    %c0_75 = arith.constant 0 : index
    %c1_76 = arith.constant 1 : index
    %c2_77 = arith.constant 2 : index
    %c0_78 = arith.constant 0 : index
    %63 = vector.load %arg1[%c0_75, %c1_76, %c2_77, %c0_78] : memref<8x4x4x16xf32, #tpu.memory_space<vmem>>, vector<8x1x1x16xf32>
    %64 = vector.shape_cast %63 : vector<8x1x1x16xf32> to vector<8x16xf32>
    %c1_79 = arith.constant 1 : index
    %c0_80 = arith.constant 0 : index
    %c0_81 = arith.constant 0 : index
    %65 = vector.load %arg2[%c1_79, %c0_80, %c0_81] : memref<4x16x32xf32, #tpu.memory_space<vmem>>, vector<1x16x32xf32>
    %66 = vector.shape_cast %65 : vector<1x16x32xf32> to vector<16x32xf32>
    %cst_82 = arith.constant dense<0.000000e+00> : vector<8x32xf32>
    %67 = tpu.matmul %64, %66, %cst_82 {dimension_numbers = #tpu.dot_dimension_numbers<[1], [0], [0], [1], [0, 0, 1, 1], [], []>} : vector<8x16xf32>, vector<16x32xf32>, vector<8x32xf32> -> vector<8x32xf32>
    %68 = arith.addf %62, %67 : vector<8x32xf32>
    %c0_83 = arith.constant 0 : index
    %c2_84 = arith.constant 2 : index
    %c2_85 = arith.constant 2 : index
    %c0_86 = arith.constant 0 : index
    %69 = vector.load %arg1[%c0_83, %c2_84, %c2_85, %c0_86] : memref<8x4x4x16xf32, #tpu.memory_space<vmem>>, vector<8x1x1x16xf32>
    %70 = vector.shape_cast %69 : vector<8x1x1x16xf32> to vector<8x16xf32>
    %c2_87 = arith.constant 2 : index
    %c0_88 = arith.constant 0 : index
    %c0_89 = arith.constant 0 : index
    %71 = vector.load %arg2[%c2_87, %c0_88, %c0_89] : memref<4x16x32xf32, #tpu.memory_space<vmem>>, vector<1x16x32xf32>
    %72 = vector.shape_cast %71 : vector<1x16x32xf32> to vector<16x32xf32>
    %cst_90 = arith.constant dense<0.000000e+00> : vector<8x32xf32>
    %73 = tpu.matmul %70, %72, %cst_90 {dimension_numbers = #tpu.dot_dimension_numbers<[1], [0], [0], [1], [0, 0, 1, 1], [], []>} : vector<8x16xf32>, vector<16x32xf32>, vector<8x32xf32> -> vector<8x32xf32>
    %74 = arith.addf %68, %73 : vector<8x32xf32>
    %c0_91 = arith.constant 0 : index
    %c3_92 = arith.constant 3 : index
    %c2_93 = arith.constant 2 : index
    %c0_94 = arith.constant 0 : index
    %75 = vector.load %arg1[%c0_91, %c3_92, %c2_93, %c0_94] : memref<8x4x4x16xf32, #tpu.memory_space<vmem>>, vector<8x1x1x16xf32>
    %76 = vector.shape_cast %75 : vector<8x1x1x16xf32> to vector<8x16xf32>
    %c3_95 = arith.constant 3 : index
    %c0_96 = arith.constant 0 : index
    %c0_97 = arith.constant 0 : index
    %77 = vector.load %arg2[%c3_95, %c0_96, %c0_97] : memref<4x16x32xf32, #tpu.memory_space<vmem>>, vector<1x16x32xf32>
    %78 = vector.shape_cast %77 : vector<1x16x32xf32> to vector<16x32xf32>
    %cst_98 = arith.constant dense<0.000000e+00> : vector<8x32xf32>
    %79 = tpu.matmul %76, %78, %cst_98 {dimension_numbers = #tpu.dot_dimension_numbers<[1], [0], [0], [1], [0, 0, 1, 1], [], []>} : vector<8x16xf32>, vector<16x32xf32>, vector<8x32xf32> -> vector<8x32xf32>
    %80 = arith.addf %74, %79 : vector<8x32xf32>
    %c0_99 = arith.constant 0 : index
    %c2_100 = arith.constant 2 : index
    %c0_101 = arith.constant 0 : index
    %81 = vector.load %arg4[%c0_99, %c2_100, %c0_101] : memref<8x4x32xf32, #tpu.memory_space<vmem>>, vector<8x1x32xf32>
    %82 = vector.shape_cast %81 : vector<8x1x32xf32> to vector<8x32xf32>
    %83 = vector.shape_cast %80 : vector<8x32xf32> to vector<8x1x32xf32>
    tpu.vector_store %arg4[%c0_99, %c2_100, %c0_101], %83 {strides = array<i32>} : memref<8x4x32xf32, #tpu.memory_space<vmem>>, vector<8x1x32xf32>,
    %c0_102 = arith.constant 0 : index
    %c0_103 = arith.constant 0 : index
    %c3_104 = arith.constant 3 : index
    %c0_105 = arith.constant 0 : index
    %84 = vector.load %arg1[%c0_102, %c0_103, %c3_104, %c0_105] : memref<8x4x4x16xf32, #tpu.memory_space<vmem>>, vector<8x1x1x16xf32>
    %85 = vector.shape_cast %84 : vector<8x1x1x16xf32> to vector<8x16xf32>
    %c0_106 = arith.constant 0 : index
    %c0_107 = arith.constant 0 : index
    %c0_108 = arith.constant 0 : index
    %86 = vector.load %arg2[%c0_106, %c0_107, %c0_108] : memref<4x16x32xf32, #tpu.memory_space<vmem>>, vector<1x16x32xf32>
    %87 = vector.shape_cast %86 : vector<1x16x32xf32> to vector<16x32xf32>
    %cst_109 = arith.constant dense<0.000000e+00> : vector<8x32xf32>
    %88 = tpu.matmul %85, %87, %cst_109 {dimension_numbers = #tpu.dot_dimension_numbers<[1], [0], [0], [1], [0, 0, 1, 1], [], []>} : vector<8x16xf32>, vector<16x32xf32>, vector<8x32xf32> -> vector<8x32xf32>
    %89 = arith.addf %2, %88 : vector<8x32xf32>
    %c0_110 = arith.constant 0 : index
    %c1_111 = arith.constant 1 : index
    %c3_112 = arith.constant 3 : index
    %c0_113 = arith.constant 0 : index
    %90 = vector.load %arg1[%c0_110, %c1_111, %c3_112, %c0_113] : memref<8x4x4x16xf32, #tpu.memory_space<vmem>>, vector<8x1x1x16xf32>
    %91 = vector.shape_cast %90 : vector<8x1x1x16xf32> to vector<8x16xf32>
    %c1_114 = arith.constant 1 : index
    %c0_115 = arith.constant 0 : index
    %c0_116 = arith.constant 0 : index
    %92 = vector.load %arg2[%c1_114, %c0_115, %c0_116] : memref<4x16x32xf32, #tpu.memory_space<vmem>>, vector<1x16x32xf32>
    %93 = vector.shape_cast %92 : vector<1x16x32xf32> to vector<16x32xf32>
    %cst_117 = arith.constant dense<0.000000e+00> : vector<8x32xf32>
    %94 = tpu.matmul %91, %93, %cst_117 {dimension_numbers = #tpu.dot_dimension_numbers<[1], [0], [0], [1], [0, 0, 1, 1], [], []>} : vector<8x16xf32>, vector<16x32xf32>, vector<8x32xf32> -> vector<8x32xf32>
    %95 = arith.addf %89, %94 : vector<8x32xf32>
    %c0_118 = arith.constant 0 : index
    %c2_119 = arith.constant 2 : index
    %c3_120 = arith.constant 3 : index
    %c0_121 = arith.constant 0 : index
    %96 = vector.load %arg1[%c0_118, %c2_119, %c3_120, %c0_121] : memref<8x4x4x16xf32, #tpu.memory_space<vmem>>, vector<8x1x1x16xf32>
    %97 = vector.shape_cast %96 : vector<8x1x1x16xf32> to vector<8x16xf32>
    %c2_122 = arith.constant 2 : index
    %c0_123 = arith.constant 0 : index
    %c0_124 = arith.constant 0 : index
    %98 = vector.load %arg2[%c2_122, %c0_123, %c0_124] : memref<4x16x32xf32, #tpu.memory_space<vmem>>, vector<1x16x32xf32>
    %99 = vector.shape_cast %98 : vector<1x16x32xf32> to vector<16x32xf32>
    %cst_125 = arith.constant dense<0.000000e+00> : vector<8x32xf32>
    %100 = tpu.matmul %97, %99, %cst_125 {dimension_numbers = #tpu.dot_dimension_numbers<[1], [0], [0], [1], [0, 0, 1, 1], [], []>} : vector<8x16xf32>, vector<16x32xf32>, vector<8x32xf32> -> vector<8x32xf32>
    %101 = arith.addf %95, %100 : vector<8x32xf32>
    %c0_126 = arith.constant 0 : index
    %c3_127 = arith.constant 3 : index
    %c3_128 = arith.constant 3 : index
    %c0_129 = arith.constant 0 : index
    %102 = vector.load %arg1[%c0_126, %c3_127, %c3_128, %c0_129] : memref<8x4x4x16xf32, #tpu.memory_space<vmem>>, vector<8x1x1x16xf32>
    %103 = vector.shape_cast %102 : vector<8x1x1x16xf32> to vector<8x16xf32>
    %c3_130 = arith.constant 3 : index
    %c0_131 = arith.constant 0 : index
    %c0_132 = arith.constant 0 : index
    %104 = vector.load %arg2[%c3_130, %c0_131, %c0_132] : memref<4x16x32xf32, #tpu.memory_space<vmem>>, vector<1x16x32xf32>
    %105 = vector.shape_cast %104 : vector<1x16x32xf32> to vector<16x32xf32>
    %cst_133 = arith.constant dense<0.000000e+00> : vector<8x32xf32>
    %106 = tpu.matmul %103, %105, %cst_133 {dimension_numbers = #tpu.dot_dimension_numbers<[1], [0], [0], [1], [0, 0, 1, 1], [], []>} : vector<8x16xf32>, vector<16x32xf32>, vector<8x32xf32> -> vector<8x32xf32>
    %107 = arith.addf %101, %106 : vector<8x32xf32>
    %c0_134 = arith.constant 0 : index
    %c3_135 = arith.constant 3 : index
    %c0_136 = arith.constant 0 : index
    %108 = vector.load %arg4[%c0_134, %c3_135, %c0_136] : memref<8x4x32xf32, #tpu.memory_space<vmem>>, vector<8x1x32xf32>
    %109 = vector.shape_cast %108 : vector<8x1x32xf32> to vector<8x32xf32>
    %110 = vector.shape_cast %107 : vector<8x32xf32> to vector<8x1x32xf32>
    tpu.vector_store %arg4[%c0_134, %c3_135, %c0_136], %110 {strides = array<i32>} : memref<8x4x32xf32, #tpu.memory_space<vmem>>, vector<8x1x32xf32>,
    return
  }
  func.func @transform_0(%arg0: i32) -> (i32, i32, i32, i32) {
    %c0_i32 = arith.constant 0 : i32
    %c0_i32_0 = arith.constant 0 : i32
    %c0_i32_1 = arith.constant 0 : i32
    %c0_i32_2 = arith.constant 0 : i32
    return %arg0, %c0_i32, %c0_i32_0, %c0_i32_1 : i32, i32, i32, i32
  }
  func.func @transform_1(%arg0: i32) -> (i32, i32, i32) {
    %c0_i32 = arith.constant 0 : i32
    %c0_i32_0 = arith.constant 0 : i32
    %c0_i32_1 = arith.constant 0 : i32
    %c0_i32_2 = arith.constant 0 : i32
    return %c0_i32, %c0_i32_0, %c0_i32_1 : i32, i32, i32
  }
  func.func @transform_2(%arg0: i32) -> (i32, i32) {
    %c0_i32 = arith.constant 0 : i32
    %c0_i32_0 = arith.constant 0 : i32
    %c0_i32_1 = arith.constant 0 : i32
    return %c0_i32, %c0_i32_0 : i32, i32
  }
  func.func @transform_3(%arg0: i32) -> (i32, i32, i32) {
    %c0_i32 = arith.constant 0 : i32
    %c0_i32_0 = arith.constant 0 : i32
    %c0_i32_1 = arith.constant 0 : i32
    return %arg0, %c0_i32, %c0_i32_0 : i32, i32, i32
  }
}

</mosaic_0001>

<bundles_post_ra>
// kernel: tpu_custom_call.1
= control target key start
LH: loop header
LB: loop body
LE: loop exit
PB: predicated region body
PF: predicated region fallthrough
CT: control target
= control target key end

     0   :  { %8 = vsyncpa [#allocation3], 0  ;;  %s2697_s0 = inlined_call_operand.hbm [shape: f32[8,4,4,16], index: 0, kind: input, shape index: {}]   ;;  %s2698_s1 = inlined_call_operand.hbm [shape: f32[4,16,32], index: 1, kind: input, shape index: {}]   ;;  %s2699_s2 = inlined_call_operand.vmem [shape: f32[1,32], index: 2, kind: input, shape index: {}]   ;;  %s2700_s3 = inlined_call_operand.hbm [shape: f32[8,4,32], index: 3, kind: output, shape index: {}]  }
   0x1   :  { %9 = vsyncpa [#allocation6], 0 }
   0x2   :  { %10 = vsyncpa [#allocation4], 0  ;;  %s2363_s12 = smov [#allocation2]   ;;  %s2291_s16 = scalar_lea.hbm %s2697_s0, 2048 }
   0x3   :  { %s16_s13 = sshll.u32 %s2363_s12, 4  ;;  %p2292_p0 = scmp.ne.s32.totalorder %s2697_s0, %s2291_s16  ;;  %s17_s13 = int_to_ptr.vmem [resolvable:$true] %s16_s13 }
   0x4   :  { %p2295_p1 = scmp.lt.u32.totalorder %s2291_s16, %s2697_s0 }
   0x6   :  { %p2297_p2 = pnand %p2295_p1, %p2292_p0 }
   0x8   :  { %2300 = shalt.err (!%p2297_p2)
}
   0x9   :  { %s2301_s21 = scalar_lea.vmem %s17_s13, 2048  ;;  %p2306_p4 = scmp.lt.s32.totalorder %s17_s13, %s17_s13 }
   0xa   :  { %p2302_p3 = scmp.ne.s32.totalorder %s17_s13, %s2301_s21  ;;  %p2307_p5 = scmp.lt.s32.totalorder %s2301_s21, %s2301_s21 }
   0xc   :  { %p2308_p6 = por %p2307_p5, %p2306_p4 }
   0xe   :  { %p2309_p7 = pnand %p2308_p6, %p2302_p3 }
  0x10   :  { %2312 = shalt.err (!%p2309_p7)
}
  0x11   :  { %s2364_s22 = smov 64   ;;  %s2365_s23 = smov 4  }
  0x12   :  { %22 = dma.hbm_to_vmem [thread:$0]  %s2697_s0, 2048, %s17_s13, [#allocation3], %s2364_s22, %s2364_s22, %s2365_s23  }
  0x13   :  { %s2366_s26 = smov [#allocation5]   ;;  %s2313_s30 = scalar_lea.hbm %s2698_s1, 1024 }
  0x14   :  { %s28_s27 = sshll.u32 %s2366_s26, 4  ;;  %p2314_p8 = scmp.ne.s32.totalorder %s2698_s1, %s2313_s30  ;;  %s29_s27 = int_to_ptr.vmem [resolvable:$true] %s28_s27 }
  0x15   :  { %p2317_p9 = scmp.lt.u32.totalorder %s2313_s30, %s2698_s1 }
  0x17   :  { %p2319_p10 = pnand %p2317_p9, %p2314_p8 }
  0x19   :  { %2322 = shalt.err (!%p2319_p10)
}
  0x1a   :  { %s2323_s8 = scalar_lea.vmem %s29_s27, 1024  ;;  %p2328_p12 = scmp.lt.s32.totalorder %s29_s27, %s29_s27 }
  0x1b   :  { %p2324_p11 = scmp.ne.s32.totalorder %s29_s27, %s2323_s8  ;;  %p2329_p13 = scmp.lt.s32.totalorder %s2323_s8, %s2323_s8 }
  0x1d   :  { %p2330_p0 = por %p2329_p13, %p2328_p12 }
  0x1f   :  { %p2331_p1 = pnand %p2330_p0, %p2324_p11 }
  0x21   :  { %2334 = shalt.err (!%p2331_p1)
}
  0x22   :  { %s2367_s0 = smov 128   ;;  %s2368_s9 = smov 8  }
  0x23   :  { %34 = dma.hbm_to_vmem [thread:$0]  %s2698_s1, 1024, %s29_s27, [#allocation6], %s2367_s0, %s2367_s0, %s2368_s9  }
  0x24   :  { %2357 = dma.done.wait [#allocation3], 2048  }
  0x25   :  { %2358 = vsyncadd [#allocation3], 4294965248 }
  0x26   :  { %2359 = dma.done.wait [#allocation6], 1024  }
  0x27   :  { %2360 = vsyncadd [#allocation6], 4294966272  ;;  %v2369_v0 = vmov 0.0|0.0   ;;  %vm2370_vm0 = vmmov 0   ;;  %v2371_v1 = vmov 0.0   ;;  %vm69_vm1 = vcmask 1041409  }
  0x28   :  { %2204 = vmatprep.subr.bf16.mxu0 %v2369_v0  ;;  %2216 = vmatprep.subr.bf16.mxu1 %v2369_v0  ;;  %vm72_vm2 = vcmask 1042434   ;;  %vm75_vm3 = vcmask 1043459   ;;  %vm78_vm4 = vcmask 1044484   ;;  %vm81_vm5 = vcmask 1045509   ;;  %v58_v2 = vld [vmem:[#allocation5] sm:$0xff]  ;;  %v59_v3 = vld [vmem:[#allocation5 + $0x8] sm:$0xff] }
  0x29   :  { %2096 = vmatprep.mubr.msk.f32.mxu0 %vm2370_vm0, %v2371_v1  ;;  %2124 = vmatprep.mubr.msk.f32.mxu1 %vm2370_vm0, %v2371_v1  ;;  %v50_v4 = vld [vmem:[#allocation2] sm:$0x1]  ;;  %vm84_vm6 = vcmask 1046534   ;;  %vm87_vm7 = vcmask 1047559   ;;  %v2427_v5 = vpack.c.bf16 %v59_v3, %v58_v2  ;;  %v51_v6 = vld [vmem:[#allocation2 + $0x10] sm:$0x1] }
  0x2a   :  { %v52_v7 = vld [vmem:[#allocation2 + $0x20] sm:$0x1]  ;;  %v53_v8 = vld [vmem:[#allocation2 + $0x30] sm:$0x1]  ;;  %v68_v13 = vrot.slane %v51_v6, 7  ;;  %vm89_vm8 = vcmask 130048  }
  0x2b   :  { %v54_v9 = vld [vmem:[#allocation2 + $0x40] sm:$0x1]  ;;  %v55_v10 = vld [vmem:[#allocation2 + $0x50] sm:$0x1]  ;;  %2206 = vmatpush3.bf16.msra.mxu0 %v2427_v5  ;;  %2218 = vmatpush3.bf16.msra.mxu1 %v2427_v5  ;;  %v71_v14 = vrot.slane %v52_v7, 6  ;;  %v74_v15 = vrot.slane %v53_v8, 5 }
  0x2c   :  { %v56_v11 = vld [vmem:[#allocation2 + $0x60] sm:$0x1]  ;;  %v57_v12 = vld [vmem:[#allocation2 + $0x70] sm:$0x1]  ;;  %2207 = vmatprep.subr.bf16.mxu0 %v2369_v0  ;;  %2219 = vmatprep.subr.bf16.mxu1 %v2369_v0  ;;  %v77_v16 = vrot.slane %v54_v9, 4  ;;  %v80_v17 = vrot.slane %v55_v10, 3  ;;  %v70_v22 = vsel %vm69_vm1, %v68_v13, %v50_v4 }
  0x2d   :  { %v83_v18 = vrot.slane %v56_v11, 2  ;;  %v86_v19 = vrot.slane %v57_v12, 1  ;;  %v173_v20 = vld [vmem:[#allocation5 + $0x10] sm:$0xff]  ;;  %v174_v21 = vld [vmem:[#allocation5 + $0x18] sm:$0xff]  ;;  %v551_v23 = vld [vmem:[#allocation2 + $0x1] sm:$0x1]  ;;  %v73_v26 = vsel %vm72_vm2, %v71_v14, %v70_v22 }
  0x2e   :  { %v552_v24 = vld [vmem:[#allocation2 + $0x11] sm:$0x1]  ;;  %v553_v25 = vld [vmem:[#allocation2 + $0x21] sm:$0x1]  ;;  %v76_v30 = vsel %vm75_vm3, %v74_v15, %v73_v26  ;;  %v2436_v31 = vpack.c.bf16 %v174_v21, %v173_v20  ;;  %v164_v40 = vld [vmem:[#allocation2 + $0x4] sm:$0x1] }
  0x2f   :  { %v554_v27 = vld [vmem:[#allocation2 + $0x31] sm:$0x1]  ;;  %v555_v28 = vld [vmem:[#allocation2 + $0x41] sm:$0x1]  ;;  %v569_v34 = vrot.slane %v552_v24, 7  ;;  %v571_v35 = vrot.slane %v553_v25, 6  ;;  %v79_v36 = vsel %vm78_vm4, %v77_v16, %v76_v30 }
  0x30   :  { %v556_v29 = vld [vmem:[#allocation2 + $0x51] sm:$0x1]  ;;  %v557_v32 = vld [vmem:[#allocation2 + $0x61] sm:$0x1]  ;;  %v573_v37 = vrot.slane %v554_v27, 5  ;;  %v575_v38 = vrot.slane %v555_v28, 4  ;;  %v82_v41 = vsel %vm81_vm5, %v80_v17, %v79_v36 }
  0x31   :  { %v558_v33 = vld [vmem:[#allocation2 + $0x71] sm:$0x1]  ;;  %v577_v39 = vrot.slane %v556_v29, 3  ;;  %v570_v42 = vsel %vm69_vm1, %v569_v34, %v551_v23  ;;  %v579_v43 = vrot.slane %v557_v32, 2  ;;  %v165_v45 = vld [vmem:[#allocation2 + $0x14] sm:$0x1]  ;;  %v85_v49 = vsel %vm84_vm6, %v83_v18, %v82_v41 }
  0x32   :  { %v581_v44 = vrot.slane %v558_v33, 1  ;;  %v166_v46 = vld [vmem:[#allocation2 + $0x24] sm:$0x1]  ;;  %v281_v48 = vld [vmem:[#allocation5 + $0x28] sm:$0xff]  ;;  %v572_v50 = vsel %vm72_vm2, %v571_v35, %v570_v42  ;;  %v167_v51 = vld [vmem:[#allocation2 + $0x34] sm:$0x1]  ;;  %v88_v54 = vsel %vm87_vm7, %v86_v19, %v85_v49 }
  0x33   :  { %v280_v47 = vld [vmem:[#allocation5 + $0x20] sm:$0xff]  ;;  %v169_v53 = vld [vmem:[#allocation2 + $0x54] sm:$0x1]  ;;  %v574_v55 = vsel %vm75_vm3, %v573_v37, %v572_v50  ;;  %v183_v58 = vrot.slane %v165_v45, 7  ;;  %v185_v59 = vrot.slane %v166_v46, 6  ;;  %2097 = vmatmul.mubr.msk.f32.vlgmr.msra.gmra.mrb[0].mxu0 %vm89_vm8, %v88_v54  ;;  %v187_v61 = vrot.slane %v167_v51, 5 }
  0x34   :  { %v168_v52 = vld [vmem:[#allocation2 + $0x44] sm:$0x1]  ;;  %v171_v57 = vld [vmem:[#allocation2 + $0x74] sm:$0x1]  ;;  %v576_v60 = vsel %vm78_vm4, %v575_v38, %v574_v55  ;;  %v191_v63 = vrot.slane %v169_v53, 3  ;;  %2209 = vmatpush3.bf16.msra.mxu0 %v2436_v31  ;;  %2103 = vmatprep.mubr.msk.f32.mxu0 %vm2370_vm0, %v2371_v1  ;;  %v2455_v12 = vpack.c.bf16 %v281_v48, %v280_v47  ;;  %v388_v35 = vld [vmem:[#allocation5 + $0x38] sm:$0xff] }
  0x35   :  { %v170_v56 = vld [vmem:[#allocation2 + $0x64] sm:$0x1]  ;;  %v189_v62 = vrot.slane %v168_v52, 4  ;;  %v656_v2 = vld [vmem:[#allocation2 + $0x5] sm:$0x1]  ;;  %v578_v3 = vsel %vm81_vm5, %v577_v39, %v576_v60  ;;  %v184_v4 = vsel %vm69_vm1, %v183_v58, %v164_v40  ;;  %v195_v7 = vrot.slane %v171_v57, 1  ;;  %2210 = vmatprep.subr.bf16.mxu0 %v2369_v0 }
  0x36   :  { %v193_v6 = vrot.slane %v170_v56, 2  ;;  %v657_v8 = vld [vmem:[#allocation2 + $0x15] sm:$0x1]  ;;  %v658_v9 = vld [vmem:[#allocation2 + $0x25] sm:$0x1]  ;;  %v580_v10 = vsel %vm84_vm6, %v579_v43, %v578_v3  ;;  %v186_v11 = vsel %vm72_vm2, %v185_v59, %v184_v4  ;;  %vm542_vm9 = vcmask 253952  }
  0x37   :  { %v659_v13 = vld [vmem:[#allocation2 + $0x35] sm:$0x1]  ;;  %v660_v14 = vld [vmem:[#allocation2 + $0x45] sm:$0x1]  ;;  %v582_v16 = vsel %vm87_vm7, %v581_v44, %v580_v10  ;;  %v188_v17 = vsel %vm75_vm3, %v187_v61, %v186_v11  ;;  %v674_v20 = vrot.slane %v657_v8, 7  ;;  %v676_v21 = vrot.slane %v658_v9, 6 }
  0x38   :  { %v661_v15 = vld [vmem:[#allocation2 + $0x55] sm:$0x1]  ;;  %v662_v18 = vld [vmem:[#allocation2 + $0x65] sm:$0x1]  ;;  %2125 = vmatmul.mubr.msk.f32.vlgmr.msra.gmra.mrb[0].mxu1 %vm89_vm8, %v582_v16  ;;  %v190_v22 = vsel %vm78_vm4, %v189_v62, %v188_v17  ;;  %v678_v23 = vrot.slane %v659_v13, 5  ;;  %v680_v24 = vrot.slane %v660_v14, 4 }
  0x39   :  { %v663_v19 = vld [vmem:[#allocation2 + $0x75] sm:$0x1]  ;;  %v682_v25 = vrot.slane %v661_v15, 3  ;;  %v271_v26 = vld [vmem:[#allocation2 + $0x8] sm:$0x1]  ;;  %2221 = vmatpush3.bf16.msra.mxu1 %v2436_v31  ;;  %2131 = vmatprep.mubr.msk.f32.mxu1 %vm2370_vm0, %v2371_v1  ;;  %v192_v27 = vsel %vm81_vm5, %v191_v63, %v190_v22  ;;  %v675_v28 = vsel %vm69_vm1, %v674_v20, %v656_v2  ;;  %v684_v29 = vrot.slane %v662_v18, 2 }
  0x3a   :  { %v686_v30 = vrot.slane %v663_v19, 1  ;;  %v272_v32 = vld [vmem:[#allocation2 + $0x18] sm:$0x1]  ;;  %v273_v33 = vld [vmem:[#allocation2 + $0x28] sm:$0x1]  ;;  %v387_v34 = vld [vmem:[#allocation5 + $0x30] sm:$0xff]  ;;  %2222 = vmatprep.subr.bf16.mxu1 %v2369_v0  ;;  %v194_v36 = vsel %vm84_vm6, %v193_v6, %v192_v27  ;;  %v677_v37 = vsel %vm72_vm2, %v676_v21, %v675_v28 }
  0x3b   :  { %v274_v38 = vld [vmem:[#allocation2 + $0x38] sm:$0x1]  ;;  %v275_v39 = vld [vmem:[#allocation2 + $0x48] sm:$0x1]  ;;  %v196_v41 = vsel %vm87_vm7, %v195_v7, %v194_v36  ;;  %v679_v42 = vsel %vm75_vm3, %v678_v23, %v677_v37  ;;  %v290_v45 = vrot.slane %v272_v32, 7  ;;  %v292_v46 = vrot.slane %v273_v33, 6 }
  0x3c   :  { %v276_v40 = vld [vmem:[#allocation2 + $0x58] sm:$0x1]  ;;  %v277_v43 = vld [vmem:[#allocation2 + $0x68] sm:$0x1]  ;;  %2104 = vmatmul.mubr.msk.f32.vlgmr.msra.gmra.mrb[0].mxu0 %vm89_vm8, %v196_v41  ;;  %v681_v47 = vsel %vm78_vm4, %v680_v24, %v679_v42  ;;  %v294_v48 = vrot.slane %v274_v38, 5  ;;  %v296_v49 = vrot.slane %v275_v39, 4  ;;  %v2481_v60 = vpack.c.bf16 %v388_v35, %v387_v34 }
  0x3d   :  { %v278_v44 = vld [vmem:[#allocation2 + $0x78] sm:$0x1]  ;;  %v298_v50 = vrot.slane %v276_v40, 3  ;;  %v761_v51 = vld [vmem:[#allocation2 + $0x9] sm:$0x1]  ;;  %2212 = vmatpush3.bf16.msra.mxu0 %v2455_v12  ;;  %v683_v52 = vsel %vm81_vm5, %v682_v25, %v681_v47  ;;  %2110 = vmatprep.mubr.msk.f32.mxu0 %vm2370_vm0, %v2371_v1  ;;  %v291_v53 = vsel %vm69_vm1, %v290_v45, %v271_v26  ;;  %v300_v54 = vrot.slane %v277_v43, 2 }
  0x3e   :  { %v302_v55 = vrot.slane %v278_v44, 1  ;;  %v762_v56 = vld [vmem:[#allocation2 + $0x19] sm:$0x1]  ;;  %v763_v57 = vld [vmem:[#allocation2 + $0x29] sm:$0x1]  ;;  %v685_v58 = vsel %vm84_vm6, %v684_v29, %v683_v52  ;;  %2213 = vmatprep.subr.bf16.mxu0 %v2369_v0  ;;  %v293_v59 = vsel %vm72_vm2, %v292_v46, %v291_v53 }
  0x3f   :  { %v764_v61 = vld [vmem:[#allocation2 + $0x39] sm:$0x1]  ;;  %v765_v62 = vld [vmem:[#allocation2 + $0x49] sm:$0x1]  ;;  %v687_v2 = vsel %vm87_vm7, %v686_v30, %v685_v58  ;;  %v295_v3 = vsel %vm75_vm3, %v294_v48, %v293_v59  ;;  %v779_v7 = vrot.slane %v762_v56, 7  ;;  %v781_v8 = vrot.slane %v763_v57, 6 }
  0x40   :  { %v766_v63 = vld [vmem:[#allocation2 + $0x59] sm:$0x1]  ;;  %v767_v4 = vld [vmem:[#allocation2 + $0x69] sm:$0x1]  ;;  %2132 = vmatmul.mubr.msk.f32.vlgmr.msra.gmra.mrb[0].mxu1 %vm89_vm8, %v687_v2  ;;  %v297_v9 = vsel %vm78_vm4, %v296_v49, %v295_v3  ;;  %v783_v10 = vrot.slane %v764_v61, 5  ;;  %v785_v11 = vrot.slane %v765_v62, 4 }
  0x41   :  { %v768_v6 = vld [vmem:[#allocation2 + $0x79] sm:$0x1]  ;;  %v787_v13 = vrot.slane %v766_v63, 3  ;;  %v378_v14 = vld [vmem:[#allocation2 + $0xc] sm:$0x1]  ;;  %2224 = vmatpush3.bf16.msra.mxu1 %v2455_v12  ;;  %2138 = vmatprep.mubr.msk.f32.mxu1 %vm2370_vm0, %v2371_v1  ;;  %v299_v15 = vsel %vm81_vm5, %v298_v50, %v297_v9  ;;  %v780_v16 = vsel %vm69_vm1, %v779_v7, %v761_v51  ;;  %v789_v17 = vrot.slane %v767_v4, 2 }
  0x42   :  { %v791_v18 = vrot.slane %v768_v6, 1  ;;  %v379_v19 = vld [vmem:[#allocation2 + $0x1c] sm:$0x1]  ;;  %v380_v20 = vld [vmem:[#allocation2 + $0x2c] sm:$0x1]  ;;  %2225 = vmatprep.subr.bf16.mxu1 %v2369_v0  ;;  %v301_v21 = vsel %vm84_vm6, %v300_v54, %v299_v15  ;;  %v782_v22 = vsel %vm72_vm2, %v781_v8, %v780_v16 }
  0x43   :  { %v381_v23 = vld [vmem:[#allocation2 + $0x3c] sm:$0x1]  ;;  %v382_v24 = vld [vmem:[#allocation2 + $0x4c] sm:$0x1]  ;;  %v303_v26 = vsel %vm87_vm7, %v302_v55, %v301_v21  ;;  %v784_v27 = vsel %vm75_vm3, %v783_v10, %v782_v22  ;;  %v397_v30 = vrot.slane %v379_v19, 7  ;;  %v399_v32 = vrot.slane %v380_v20, 6 }
  0x44   :  { %v383_v25 = vld [vmem:[#allocation2 + $0x5c] sm:$0x1]  ;;  %v384_v28 = vld [vmem:[#allocation2 + $0x6c] sm:$0x1]  ;;  %2111 = vmatmul.mubr.msk.f32.vlgmr.msra.gmra.mrb[0].mxu0 %vm89_vm8, %v303_v26  ;;  %v786_v33 = vsel %vm78_vm4, %v785_v11, %v784_v27  ;;  %v401_v34 = vrot.slane %v381_v23, 5  ;;  %v403_v35 = vrot.slane %v382_v24, 4 }
  0x45   :  { %v385_v29 = vld [vmem:[#allocation2 + $0x7c] sm:$0x1]  ;;  %v405_v36 = vrot.slane %v383_v25, 3  ;;  %v866_v37 = vld [vmem:[#allocation2 + $0xd] sm:$0x1]  ;;  %2215 = vmatpush3.bf16.msra.mxu0 %v2481_v60  ;;  %v788_v38 = vsel %vm81_vm5, %v787_v13, %v786_v33  ;;  %2117 = vmatprep.mubr.msk.f32.mxu0 %vm2370_vm0, %v2371_v1  ;;  %v398_v39 = vsel %vm69_vm1, %v397_v30, %v378_v14  ;;  %v407_v40 = vrot.slane %v384_v28, 2 }
  0x46   :  { %v409_v41 = vrot.slane %v385_v29, 1  ;;  %v867_v42 = vld [vmem:[#allocation2 + $0x1d] sm:$0x1]  ;;  %v868_v43 = vld [vmem:[#allocation2 + $0x2d] sm:$0x1]  ;;  %v790_v44 = vsel %vm84_vm6, %v789_v17, %v788_v38  ;;  %2228 = vmatprep.subr.bf16.mxu0 %v2369_v0  ;;  %v400_v45 = vsel %vm72_vm2, %v399_v32, %v398_v39 }
  0x47   :  { %v869_v46 = vld [vmem:[#allocation2 + $0x3d] sm:$0x1]  ;;  %v870_v47 = vld [vmem:[#allocation2 + $0x4d] sm:$0x1]  ;;  %v792_v49 = vsel %vm87_vm7, %v791_v18, %v790_v44  ;;  %v402_v50 = vsel %vm75_vm3, %v401_v34, %v400_v45  ;;  %v884_v53 = vrot.slane %v867_v42, 7  ;;  %v886_v54 = vrot.slane %v868_v43, 6 }
  0x48   :  { %v871_v48 = vld [vmem:[#allocation2 + $0x5d] sm:$0x1]  ;;  %v872_v51 = vld [vmem:[#allocation2 + $0x6d] sm:$0x1]  ;;  %2139 = vmatmul.mubr.msk.f32.vlgmr.msra.gmra.mrb[0].mxu1 %vm89_vm8, %v792_v49  ;;  %v404_v55 = vsel %vm78_vm4, %v403_v35, %v402_v50  ;;  %v888_v56 = vrot.slane %v869_v46, 5  ;;  %v890_v57 = vrot.slane %v870_v47, 4 }
  0x49   :  { %v873_v52 = vld [vmem:[#allocation2 + $0x7d] sm:$0x1]  ;;  %v892_v58 = vrot.slane %v871_v48, 3  ;;  %v1037_v59 = vld [vmem:[#allocation2 + $0x2] sm:$0x1]  ;;  %2227 = vmatpush3.bf16.msra.mxu1 %v2481_v60  ;;  %2145 = vmatprep.mubr.msk.f32.mxu1 %vm2370_vm0, %v2371_v1  ;;  %v406_v61 = vsel %vm81_vm5, %v405_v36, %v404_v55  ;;  %v885_v62 = vsel %vm69_vm1, %v884_v53, %v866_v37  ;;  %v894_v63 = vrot.slane %v872_v51, 2 }
  0x4a   :  { %v896_v2 = vrot.slane %v873_v52, 1  ;;  %v1038_v3 = vld [vmem:[#allocation2 + $0x12] sm:$0x1]  ;;  %v1039_v4 = vld [vmem:[#allocation2 + $0x22] sm:$0x1]  ;;  %2240 = vmatprep.subr.bf16.mxu1 %v2369_v0  ;;  %v408_v6 = vsel %vm84_vm6, %v407_v40, %v406_v61  ;;  %v887_v7 = vsel %vm72_vm2, %v886_v54, %v885_v62 }
  0x4b   :  { %v1040_v8 = vld [vmem:[#allocation2 + $0x32] sm:$0x1]  ;;  %v1041_v9 = vld [vmem:[#allocation2 + $0x42] sm:$0x1]  ;;  %v410_v11 = vsel %vm87_vm7, %v409_v41, %v408_v6  ;;  %v889_v13 = vsel %vm75_vm3, %v888_v56, %v887_v7  ;;  %v1055_v16 = vrot.slane %v1038_v3, 7  ;;  %v1057_v17 = vrot.slane %v1039_v4, 6 }
  0x4c   :  { %v1042_v10 = vld [vmem:[#allocation2 + $0x52] sm:$0x1]  ;;  %v1043_v14 = vld [vmem:[#allocation2 + $0x62] sm:$0x1]  ;;  %2118 = vmatmul.mubr.msk.f32.vlgmr.msra.gmra.mrb[0].mxu0 %vm89_vm8, %v410_v11  ;;  %v891_v18 = vsel %vm78_vm4, %v890_v57, %v889_v13  ;;  %v1059_v19 = vrot.slane %v1040_v8, 5  ;;  %v1061_v20 = vrot.slane %v1041_v9, 4 }
  0x4d   :  { %v1044_v15 = vld [vmem:[#allocation2 + $0x72] sm:$0x1]  ;;  %v1063_v21 = vrot.slane %v1042_v10, 3  ;;  %v1523_v22 = vld [vmem:[#allocation2 + $0x3] sm:$0x1]  ;;  %v893_v23 = vsel %vm81_vm5, %v892_v58, %v891_v18  ;;  %2230 = vmatpush3.bf16.msra.mxu0 %v2427_v5  ;;  %2152 = vmatprep.mubr.msk.f32.mxu0 %vm2370_vm0, %v2371_v1  ;;  %v1056_v24 = vsel %vm69_vm1, %v1055_v16, %v1037_v59  ;;  %v1065_v25 = vrot.slane %v1043_v14, 2 }
  0x4e   :  { %v1067_v26 = vrot.slane %v1044_v15, 1  ;;  %v1524_v27 = vld [vmem:[#allocation2 + $0x13] sm:$0x1]  ;;  %v1525_v28 = vld [vmem:[#allocation2 + $0x23] sm:$0x1]  ;;  %v895_v29 = vsel %vm84_vm6, %v894_v63, %v893_v23  ;;  %2231 = vmatprep.subr.bf16.mxu0 %v2369_v0  ;;  %v1058_v30 = vsel %vm72_vm2, %v1057_v17, %v1056_v24 }
  0x4f   :  { %v1526_v32 = vld [vmem:[#allocation2 + $0x33] sm:$0x1]  ;;  %v1527_v33 = vld [vmem:[#allocation2 + $0x43] sm:$0x1]  ;;  %v897_v35 = vsel %vm87_vm7, %v896_v2, %v895_v29  ;;  %v1060_v36 = vsel %vm75_vm3, %v1059_v19, %v1058_v30  ;;  %v1541_v39 = vrot.slane %v1524_v27, 7  ;;  %v1543_v40 = vrot.slane %v1525_v28, 6 }
  0x50   :  { %v1528_v34 = vld [vmem:[#allocation2 + $0x53] sm:$0x1]  ;;  %v1529_v37 = vld [vmem:[#allocation2 + $0x63] sm:$0x1]  ;;  %2146 = vmatmul.mubr.msk.f32.vlgmr.msra.gmra.mrb[0].mxu1 %vm89_vm8, %v897_v35  ;;  %v1062_v41 = vsel %vm78_vm4, %v1061_v20, %v1060_v36  ;;  %v1545_v42 = vrot.slane %v1526_v32, 5  ;;  %v1547_v43 = vrot.slane %v1527_v33, 4 }
  0x51   :  { %v1530_v38 = vld [vmem:[#allocation2 + $0x73] sm:$0x1]  ;;  %v1549_v44 = vrot.slane %v1528_v34, 3  ;;  %v1142_v45 = vld [vmem:[#allocation2 + $0x6] sm:$0x1]  ;;  %2242 = vmatpush3.bf16.msra.mxu1 %v2427_v5  ;;  %2180 = vmatprep.mubr.msk.f32.mxu1 %vm2370_vm0, %v2371_v1  ;;  %v1064_v46 = vsel %vm81_vm5, %v1063_v21, %v1062_v41  ;;  %v1542_v47 = vsel %vm69_vm1, %v1541_v39, %v1523_v22  ;;  %v1551_v48 = vrot.slane %v1529_v37, 2 }
  0x52   :  { %v1553_v49 = vrot.slane %v1530_v38, 1  ;;  %v1143_v50 = vld [vmem:[#allocation2 + $0x16] sm:$0x1]  ;;  %v1144_v51 = vld [vmem:[#allocation2 + $0x26] sm:$0x1]  ;;  %2243 = vmatprep.subr.bf16.mxu1 %v2369_v0  ;;  %v1066_v52 = vsel %vm84_vm6, %v1065_v25, %v1064_v46  ;;  %v1544_v53 = vsel %vm72_vm2, %v1543_v40, %v1542_v47 }
  0x53   :  { %v1145_v54 = vld [vmem:[#allocation2 + $0x36] sm:$0x1]  ;;  %v1146_v55 = vld [vmem:[#allocation2 + $0x46] sm:$0x1]  ;;  %v1068_v56 = vsel %vm87_vm7, %v1067_v26, %v1066_v52  ;;  %v1546_v57 = vsel %vm75_vm3, %v1545_v42, %v1544_v53  ;;  %v1160_v61 = vrot.slane %v1143_v50, 7  ;;  %v1162_v62 = vrot.slane %v1144_v51, 6 }
  0x54   :  { %v1147_v5 = vld [vmem:[#allocation2 + $0x56] sm:$0x1]  ;;  %v1148_v58 = vld [vmem:[#allocation2 + $0x66] sm:$0x1]  ;;  %2153 = vmatmul.mubr.msk.f32.vlgmr.msra.gmra.mrb[2].mxu0 %vm89_vm8, %v1068_v56  ;;  %v1548_v63 = vsel %vm78_vm4, %v1547_v43, %v1546_v57  ;;  %v1164_v2 = vrot.slane %v1145_v54, 5  ;;  %v1166_v3 = vrot.slane %v1146_v55, 4 }
  0x55   :  { %v1149_v59 = vld [vmem:[#allocation2 + $0x76] sm:$0x1]  ;;  %v1168_v4 = vrot.slane %v1147_v5, 3  ;;  %v1628_v6 = vld [vmem:[#allocation2 + $0x7] sm:$0x1]  ;;  %2233 = vmatpush3.bf16.msra.mxu0 %v2436_v31  ;;  %v1550_v7 = vsel %vm81_vm5, %v1549_v44, %v1548_v63  ;;  %2159 = vmatprep.mubr.msk.f32.mxu0 %vm2370_vm0, %v2371_v1  ;;  %v1161_v8 = vsel %vm69_vm1, %v1160_v61, %v1142_v45  ;;  %v1170_v9 = vrot.slane %v1148_v58, 2 }
  0x56   :  { %v1172_v10 = vrot.slane %v1149_v59, 1  ;;  %v1629_v11 = vld [vmem:[#allocation2 + $0x17] sm:$0x1]  ;;  %v1630_v13 = vld [vmem:[#allocation2 + $0x27] sm:$0x1]  ;;  %v1552_v14 = vsel %vm84_vm6, %v1551_v48, %v1550_v7  ;;  %2234 = vmatprep.subr.bf16.mxu0 %v2369_v0  ;;  %v1163_v15 = vsel %vm72_vm2, %v1162_v62, %v1161_v8 }
  0x57   :  { %v1631_v16 = vld [vmem:[#allocation2 + $0x37] sm:$0x1]  ;;  %v1632_v17 = vld [vmem:[#allocation2 + $0x47] sm:$0x1]  ;;  %v1554_v19 = vsel %vm87_vm7, %v1553_v49, %v1552_v14  ;;  %v1165_v20 = vsel %vm75_vm3, %v1164_v2, %v1163_v15  ;;  %v1646_v23 = vrot.slane %v1629_v11, 7  ;;  %v1648_v24 = vrot.slane %v1630_v13, 6 }
  0x58   :  { %v1633_v18 = vld [vmem:[#allocation2 + $0x57] sm:$0x1]  ;;  %v1634_v21 = vld [vmem:[#allocation2 + $0x67] sm:$0x1]  ;;  %2181 = vmatmul.mubr.msk.f32.vlgmr.msra.gmra.mrb[2].mxu1 %vm89_vm8, %v1554_v19  ;;  %v1167_v25 = vsel %vm78_vm4, %v1166_v3, %v1165_v20  ;;  %v1650_v26 = vrot.slane %v1631_v16, 5  ;;  %v1652_v27 = vrot.slane %v1632_v17, 4 }
  0x59   :  { %v1635_v22 = vld [vmem:[#allocation2 + $0x77] sm:$0x1]  ;;  %v1654_v28 = vrot.slane %v1633_v18, 3  ;;  %v1247_v29 = vld [vmem:[#allocation2 + $0xa] sm:$0x1]  ;;  %2245 = vmatpush3.bf16.msra.mxu1 %v2436_v31  ;;  %2187 = vmatprep.mubr.msk.f32.mxu1 %vm2370_vm0, %v2371_v1  ;;  %v1169_v30 = vsel %vm81_vm5, %v1168_v4, %v1167_v25  ;;  %v1647_v32 = vsel %vm69_vm1, %v1646_v23, %v1628_v6  ;;  %v1656_v33 = vrot.slane %v1634_v21, 2 }
  0x5a   :  { %v1658_v34 = vrot.slane %v1635_v22, 1  ;;  %v1248_v35 = vld [vmem:[#allocation2 + $0x1a] sm:$0x1]  ;;  %v1249_v36 = vld [vmem:[#allocation2 + $0x2a] sm:$0x1]  ;;  %2246 = vmatprep.subr.bf16.mxu1 %v2369_v0  ;;  %v1171_v37 = vsel %vm84_vm6, %v1170_v9, %v1169_v30  ;;  %v1649_v38 = vsel %vm72_vm2, %v1648_v24, %v1647_v32 }
  0x5b   :  { %v1250_v39 = vld [vmem:[#allocation2 + $0x3a] sm:$0x1]  ;;  %v1251_v40 = vld [vmem:[#allocation2 + $0x4a] sm:$0x1]  ;;  %v1173_v41 = vsel %vm87_vm7, %v1172_v10, %v1171_v37  ;;  %v1651_v42 = vsel %vm75_vm3, %v1650_v26, %v1649_v38  ;;  %v1265_v45 = vrot.slane %v1248_v35, 7  ;;  %v1267_v46 = vrot.slane %v1249_v36, 6 }
  0x5c   :  { %v1252_v31 = vld [vmem:[#allocation2 + $0x5a] sm:$0x1]  ;;  %v1253_v43 = vld [vmem:[#allocation2 + $0x6a] sm:$0x1]  ;;  %2160 = vmatmul.mubr.msk.f32.vlgmr.msra.gmra.mrb[2].mxu0 %vm89_vm8, %v1173_v41  ;;  %v1653_v47 = vsel %vm78_vm4, %v1652_v27, %v1651_v42  ;;  %v1269_v48 = vrot.slane %v1250_v39, 5  ;;  %v1271_v49 = vrot.slane %v1251_v40, 4 }
  0x5d   :  { %v1254_v44 = vld [vmem:[#allocation2 + $0x7a] sm:$0x1]  ;;  %v1273_v50 = vrot.slane %v1252_v31, 3  ;;  %v1733_v51 = vld [vmem:[#allocation2 + $0xb] sm:$0x1]  ;;  %2236 = vmatpush3.bf16.msra.mxu0 %v2455_v12  ;;  %v1655_v52 = vsel %vm81_vm5, %v1654_v28, %v1653_v47  ;;  %2166 = vmatprep.mubr.msk.f32.mxu0 %vm2370_vm0, %v2371_v1  ;;  %v1266_v53 = vsel %vm69_vm1, %v1265_v45, %v1247_v29  ;;  %v1275_v54 = vrot.slane %v1253_v43, 2 }
  0x5e   :  { %v1277_v55 = vrot.slane %v1254_v44, 1  ;;  %v1734_v5 = vld [vmem:[#allocation2 + $0x1b] sm:$0x1]  ;;  %v1735_v56 = vld [vmem:[#allocation2 + $0x2b] sm:$0x1]  ;;  %v1657_v57 = vsel %vm84_vm6, %v1656_v33, %v1655_v52  ;;  %2237 = vmatprep.subr.bf16.mxu0 %v2369_v0  ;;  %v1268_v58 = vsel %vm72_vm2, %v1267_v46, %v1266_v53 }
  0x5f   :  { %v1736_v59 = vld [vmem:[#allocation2 + $0x3b] sm:$0x1]  ;;  %v1737_v61 = vld [vmem:[#allocation2 + $0x4b] sm:$0x1]  ;;  %v1659_v63 = vsel %vm87_vm7, %v1658_v34, %v1657_v57  ;;  %v1270_v2 = vsel %vm75_vm3, %v1269_v48, %v1268_v58  ;;  %v1751_v6 = vrot.slane %v1734_v5, 7  ;;  %v1753_v7 = vrot.slane %v1735_v56, 6 }
  0x60   :  { %v1738_v62 = vld [vmem:[#allocation2 + $0x5b] sm:$0x1]  ;;  %v1739_v3 = vld [vmem:[#allocation2 + $0x6b] sm:$0x1]  ;;  %2188 = vmatmul.mubr.msk.f32.vlgmr.msra.gmra.mrb[2].mxu1 %vm89_vm8, %v1659_v63  ;;  %v1272_v8 = vsel %vm78_vm4, %v1271_v49, %v1270_v2  ;;  %v1755_v9 = vrot.slane %v1736_v59, 5  ;;  %v1757_v10 = vrot.slane %v1737_v61, 4 }
  0x61   :  { %v1740_v4 = vld [vmem:[#allocation2 + $0x7b] sm:$0x1]  ;;  %v1759_v11 = vrot.slane %v1738_v62, 3  ;;  %v1352_v13 = vld [vmem:[#allocation2 + $0xe] sm:$0x1]  ;;  %2248 = vmatpush3.bf16.msra.mxu1 %v2455_v12  ;;  %2194 = vmatprep.mubr.msk.f32.mxu1 %vm2370_vm0, %v2371_v1  ;;  %v1274_v14 = vsel %vm81_vm5, %v1273_v50, %v1272_v8  ;;  %v1752_v15 = vsel %vm69_vm1, %v1751_v6, %v1733_v51  ;;  %v1761_v16 = vrot.slane %v1739_v3, 2 }
  0x62   :  { %v1763_v17 = vrot.slane %v1740_v4, 1  ;;  %v1353_v18 = vld [vmem:[#allocation2 + $0x1e] sm:$0x1]  ;;  %v1354_v19 = vld [vmem:[#allocation2 + $0x2e] sm:$0x1]  ;;  %2249 = vmatprep.subr.bf16.mxu1 %v2369_v0  ;;  %v1276_v20 = vsel %vm84_vm6, %v1275_v54, %v1274_v14  ;;  %v1754_v21 = vsel %vm72_vm2, %v1753_v7, %v1752_v15  ;;  %v489_v6 = vlaneseq }
  0x63   :  { %v1355_v22 = vld [vmem:[#allocation2 + $0x3e] sm:$0x1]  ;;  %v1356_v23 = vld [vmem:[#allocation2 + $0x4e] sm:$0x1]  ;;  %v1278_v24 = vsel %vm87_vm7, %v1277_v55, %v1276_v20  ;;  %v1756_v25 = vsel %vm75_vm3, %v1755_v9, %v1754_v21  ;;  %v1370_v28 = vrot.slane %v1353_v18, 7  ;;  %v1372_v29 = vrot.slane %v1354_v19, 6 }
  0x64   :  { %v1357_v12 = vld [vmem:[#allocation2 + $0x5e] sm:$0x1]  ;;  %v1358_v26 = vld [vmem:[#allocation2 + $0x6e] sm:$0x1]  ;;  %2167 = vmatmul.mubr.msk.f32.vlgmr.msra.gmra.mrb[2].mxu0 %vm89_vm8, %v1278_v24  ;;  %v1758_v30 = vsel %vm78_vm4, %v1757_v10, %v1756_v25  ;;  %v1374_v0 = vrot.slane %v1355_v22, 5  ;;  %v1376_v32 = vrot.slane %v1356_v23, 4 }
  0x65   :  { %v1359_v27 = vld [vmem:[#allocation2 + $0x7e] sm:$0x1]  ;;  %v1378_v33 = vrot.slane %v1357_v12, 3  ;;  %v1838_v34 = vld [vmem:[#allocation2 + $0xf] sm:$0x1]  ;;  %2239 = vmatpush3.bf16.msra.mxu0 %v2481_v60  ;;  %v1760_v35 = vsel %vm81_vm5, %v1759_v11, %v1758_v30  ;;  %2173 = vmatprep.mubr.msk.f32.mxu0 %vm2370_vm0, %v2371_v1  ;;  %v1371_v36 = vsel %vm69_vm1, %v1370_v28, %v1352_v13  ;;  %v1380_v37 = vrot.slane %v1358_v26, 2 }
  0x66   :  { %v1382_v38 = vrot.slane %v1359_v27, 1  ;;  %v1839_v39 = vld [vmem:[#allocation2 + $0x1f] sm:$0x1]  ;;  %v1840_v40 = vld [vmem:[#allocation2 + $0x2f] sm:$0x1]  ;;  %v1762_v31 = vsel %vm84_vm6, %v1761_v16, %v1760_v35  ;;  %v1373_v41 = vsel %vm72_vm2, %v1372_v29, %v1371_v36  ;;  %v490_v8 = vshrl.u32 %v489_v6, 7 }
  0x67   :  { %v1841_v42 = vld [vmem:[#allocation2 + $0x3f] sm:$0x1]  ;;  %v1842_v43 = vld [vmem:[#allocation2 + $0x4f] sm:$0x1]  ;;  %v1764_v45 = vsel %vm87_vm7, %v1763_v17, %v1762_v31  ;;  %v1375_v46 = vsel %vm75_vm3, %v1374_v0, %v1373_v41  ;;  %v1856_v48 = vrot.slane %v1839_v39, 7  ;;  %v1858_v49 = vrot.slane %v1840_v40, 6 }
  0x68   :  { %v1843_v44 = vld [vmem:[#allocation2 + $0x5f] sm:$0x1]  ;;  %v1844_v47 = vld [vmem:[#allocation2 + $0x6f] sm:$0x1]  ;;  %2195 = vmatmul.mubr.msk.f32.vlgmr.msra.gmra.mrb[2].mxu1 %vm89_vm8, %v1764_v45  ;;  %v1377_v50 = vsel %vm78_vm4, %v1376_v32, %v1375_v46  ;;  %v1860_v52 = vrot.slane %v1841_v42, 5  ;;  %v1862_v53 = vrot.slane %v1842_v43, 4 }
  0x69   :  { %v1845_v51 = vld [vmem:[#allocation2 + $0x7f] sm:$0x1]  ;;  %2251 = vmatpush3.bf16.msra.mxu1 %v2481_v60  ;;  %2201 = vmatprep.mubr.msk.f32.mxu1 %vm2370_vm0, %v2371_v1  ;;  %v1379_v54 = vsel %vm81_vm5, %v1378_v33, %v1377_v50  ;;  %v1857_v55 = vsel %vm69_vm1, %v1856_v48, %v1838_v34  ;;  %v1864_v5 = vrot.slane %v1843_v44, 3  ;;  %v1866_v58 = vrot.slane %v1844_v47, 2  ;;  %v2027_v9 = vld [vmem:[%s2699_s2] ss:$0 sm:$0xff] }
  0x6a   :  { %v1381_v56 = vsel %vm84_vm6, %v1380_v37, %v1379_v54  ;;  %v1859_v57 = vsel %vm72_vm2, %v1858_v49, %v1857_v55  ;;  %v1868_v62 = vrot.slane %v1845_v51, 1  ;;  %v2372_v3 = vmov 1966171168   ;;  %s2373_s2 = smov [#allocation7]  }
  0x6b   :  { %v1383_v59 = vsel %vm87_vm7, %v1382_v38, %v1381_v56  ;;  %v1861_v61 = vsel %vm75_vm3, %v1860_v52, %v1859_v57  ;;  %v487_v4 = vunpack.c.l.s4 %v2372_v3  ;;  %s2014_s13 = sshll.u32 %s2373_s2, 4  ;;  %s2015_s13 = int_to_ptr.vmem [resolvable:$true] %s2014_s13 }
  0x6c   :  { %2174 = vmatmul.mubr.msk.f32.vlgmr.msra.gmra.mrb[2].mxu0 %vm89_vm8, %v1383_v59  ;;  %v1863_v60 = vsel %vm78_vm4, %v1862_v53, %v1861_v61  ;;  %s2335_s14 = scalar_lea.vmem %s2015_s13, 512  ;;  %p2340_p3 = scmp.lt.s32.totalorder %s2015_s13, %s2015_s13 }
  0x6d   :  { %v1865_v1 = vsel %vm81_vm5, %v1864_v5, %v1863_v60  ;;  %v488_v7 = vunpack.c.0.s8 %v487_v4  ;;  %p2336_p2 = scmp.ne.s32.totalorder %s2015_s13, %s2335_s14  ;;  %p2341_p4 = scmp.lt.s32.totalorder %s2335_s14, %s2335_s14 }
  0x6e   :  { %v1867_v63 = vsel %vm84_vm6, %v1866_v58, %v1865_v1 }
  0x6f   :  { %v1869_v2 = vsel %vm87_vm7, %v1868_v62, %v1867_v63  ;;  %v2624_v10 = vsub.s32 %v488_v7, %v490_v8  ;;  %p2342_p5 = por %p2341_p4, %p2340_p3 }
  0x70   :  { %2202 = vmatmul.mubr.msk.f32.vlgmr.msra.gmra.mrb[2].mxu1 %vm89_vm8, %v1869_v2 }
  0x71   :  { %p2343_p6 = pnand %p2342_p5, %p2336_p2 }
 0x11f   :  { %v479_v11 = vpop.f32.mrb[0].mxu0 }
 0x120   :  { %v2252_v13 = vadd.f32 %v2027_v9, %v479_v11  ;;  %v2119_v14 = vpop.f32.mrb[1].mxu0 }
 0x122   :  { %v485_v15 = vcombine.high %v2252_v13, %v2252_v13  ;;  %v492_v16 = vrot.slane %v2252_v13, %v2624_v10 }
 0x123   :  { %v966_v17 = vpop.f32.mrb[0].mxu1 }
 0x124   :  { %v499_v18 = vrot.slane %v485_v15, %v2624_v10  ;;  %v500_v19 = vcombine.high %v492_v16, %v492_v16  ;;  %v508_v20 = vrot.slane %v492_v16, %v2624_v10  ;;  %v2253_v21 = vadd.f32 %v2027_v9, %v966_v17  ;;  %v2147_v22 = vpop.f32.mrb[1].mxu1 }
 0x126   :  { %v501_v23 = vcombine.high %v499_v18, %v499_v18  ;;  %v515_v12 = vrot.slane %v499_v18, %v2624_v10  ;;  %v522_v24 = vrot.slane %v500_v19, %v2624_v10  ;;  %v530_v25 = vcombine.high %v508_v20, %v508_v20  ;;  %543 = vst.msk [vmem:[#allocation7] sm:$0x1] %vm542_vm9, %v508_v20 }
 0x127   :  { %v972_v26 = vcombine.high %v2253_v21, %v2253_v21  ;;  %v979_v27 = vrot.slane %v2253_v21, %v2624_v10 }
 0x128   :  { %v529_v28 = vrot.slane %v501_v23, %v2624_v10  ;;  %v531_v29 = vcombine.high %v515_v12, %v515_v12  ;;  %v532_v30 = vcombine.high %v522_v24, %v522_v24  ;;  %544 = vst.msk [vmem:[#allocation7 + $0x4] sm:$0x1] %vm542_vm9, %v522_v24  ;;  %545 = vst.msk [vmem:[#allocation7 + $0x8] sm:$0x1] %vm542_vm9, %v530_v25 }
 0x129   :  { %547 = vst.msk [vmem:[#allocation7 + $0x10] sm:$0x1] %vm542_vm9, %v515_v12  ;;  %v986_v0 = vrot.slane %v972_v26, %v2624_v10  ;;  %v987_v32 = vcombine.high %v979_v27, %v979_v27  ;;  %v995_v33 = vrot.slane %v979_v27, %v2624_v10 }
 0x12a   :  { %v533_v34 = vcombine.high %v529_v28, %v529_v28  ;;  %546 = vst.msk [vmem:[#allocation7 + $0xc] sm:$0x1] %vm542_vm9, %v532_v30  ;;  %548 = vst.msk [vmem:[#allocation7 + $0x14] sm:$0x1] %vm542_vm9, %v529_v28 }
 0x12b   :  { %549 = vst.msk [vmem:[#allocation7 + $0x18] sm:$0x1] %vm542_vm9, %v531_v29  ;;  %v988_v35 = vcombine.high %v986_v0, %v986_v0  ;;  %v1002_v36 = vrot.slane %v986_v0, %v2624_v10  ;;  %v1009_v37 = vrot.slane %v987_v32, %v2624_v10  ;;  %v1017_v38 = vcombine.high %v995_v33, %v995_v33 }
 0x12c   :  { %1029 = vst.msk [vmem:[#allocation7 + $0x1] sm:$0x1] %vm542_vm9, %v995_v33  ;;  %550 = vst.msk [vmem:[#allocation7 + $0x1c] sm:$0x1] %vm542_vm9, %v533_v34 }
 0x12d   :  { %v1016_v39 = vrot.slane %v988_v35, %v2624_v10  ;;  %v1018_v40 = vcombine.high %v1002_v36, %v1002_v36  ;;  %v1019_v31 = vcombine.high %v1009_v37, %v1009_v37  ;;  %1030 = vst.msk [vmem:[#allocation7 + $0x5] sm:$0x1] %vm542_vm9, %v1009_v37  ;;  %1031 = vst.msk [vmem:[#allocation7 + $0x9] sm:$0x1] %vm542_vm9, %v1017_v38 }
 0x12e   :  { %1033 = vst.msk [vmem:[#allocation7 + $0x11] sm:$0x1] %vm542_vm9, %v1002_v36 }
 0x12f   :  { %v1020_v41 = vcombine.high %v1016_v39, %v1016_v39  ;;  %1032 = vst.msk [vmem:[#allocation7 + $0xd] sm:$0x1] %vm542_vm9, %v1019_v31  ;;  %1034 = vst.msk [vmem:[#allocation7 + $0x15] sm:$0x1] %vm542_vm9, %v1016_v39 }
 0x130   :  { %1035 = vst.msk [vmem:[#allocation7 + $0x19] sm:$0x1] %vm542_vm9, %v1018_v40 }
 0x131   :  { %1036 = vst.msk [vmem:[#allocation7 + $0x1d] sm:$0x1] %vm542_vm9, %v1020_v41 }
 0x13f   :  { %v1452_v42 = vpop.f32.mrb[2].mxu0 }
 0x140   :  { %v2254_v43 = vadd.f32 %v2027_v9, %v1452_v42  ;;  %v2175_v44 = vpop.f32.mrb[3].mxu0 }
 0x142   :  { %v1458_v45 = vcombine.high %v2254_v43, %v2254_v43  ;;  %v1465_v46 = vrot.slane %v2254_v43, %v2624_v10 }
 0x143   :  { %v1938_v47 = vpop.f32.mrb[2].mxu1 }
 0x144   :  { %v1472_v48 = vrot.slane %v1458_v45, %v2624_v10  ;;  %v1473_v49 = vcombine.high %v1465_v46, %v1465_v46  ;;  %v1481_v50 = vrot.slane %v1465_v46, %v2624_v10  ;;  %v2255_v51 = vadd.f32 %v2027_v9, %v1938_v47  ;;  %v2203_v52 = vpop.f32.mrb[3].mxu1 }
 0x146   :  { %v1474_v53 = vcombine.high %v1472_v48, %v1472_v48  ;;  %v1488_v54 = vrot.slane %v1472_v48, %v2624_v10  ;;  %v1495_v55 = vrot.slane %v1473_v49, %v2624_v10  ;;  %v1503_v5 = vcombine.high %v1481_v50, %v1481_v50  ;;  %1515 = vst.msk [vmem:[#allocation7 + $0x2] sm:$0x1] %vm542_vm9, %v1481_v50 }
 0x147   :  { %v1944_v56 = vcombine.high %v2255_v51, %v2255_v51  ;;  %v1951_v57 = vrot.slane %v2255_v51, %v2624_v10 }
 0x148   :  { %v1502_v58 = vrot.slane %v1474_v53, %v2624_v10  ;;  %v1504_v59 = vcombine.high %v1488_v54, %v1488_v54  ;;  %v1505_v61 = vcombine.high %v1495_v55, %v1495_v55  ;;  %1516 = vst.msk [vmem:[#allocation7 + $0x6] sm:$0x1] %vm542_vm9, %v1495_v55  ;;  %1517 = vst.msk [vmem:[#allocation7 + $0xa] sm:$0x1] %vm542_vm9, %v1503_v5 }
 0x149   :  { %1519 = vst.msk [vmem:[#allocation7 + $0x12] sm:$0x1] %vm542_vm9, %v1488_v54  ;;  %v1958_v62 = vrot.slane %v1944_v56, %v2624_v10  ;;  %v1959_v60 = vcombine.high %v1951_v57, %v1951_v57  ;;  %v1967_v1 = vrot.slane %v1951_v57, %v2624_v10 }
 0x14a   :  { %v1506_v63 = vcombine.high %v1502_v58, %v1502_v58  ;;  %1518 = vst.msk [vmem:[#allocation7 + $0xe] sm:$0x1] %vm542_vm9, %v1505_v61  ;;  %1520 = vst.msk [vmem:[#allocation7 + $0x16] sm:$0x1] %vm542_vm9, %v1502_v58 }
 0x14b   :  { %1521 = vst.msk [vmem:[#allocation7 + $0x1a] sm:$0x1] %vm542_vm9, %v1504_v59  ;;  %v1960_v2 = vcombine.high %v1958_v62, %v1958_v62  ;;  %v1974_v3 = vrot.slane %v1958_v62, %v2624_v10  ;;  %v1981_v4 = vrot.slane %v1959_v60, %v2624_v10  ;;  %v1989_v6 = vcombine.high %v1967_v1, %v1967_v1 }
 0x14c   :  { %2001 = vst.msk [vmem:[#allocation7 + $0x3] sm:$0x1] %vm542_vm9, %v1967_v1  ;;  %1522 = vst.msk [vmem:[#allocation7 + $0x1e] sm:$0x1] %vm542_vm9, %v1506_v63 }
 0x14d   :  { %v1988_v7 = vrot.slane %v1960_v2, %v2624_v10  ;;  %v1990_v8 = vcombine.high %v1974_v3, %v1974_v3  ;;  %v1991_v9 = vcombine.high %v1981_v4, %v1981_v4  ;;  %2002 = vst.msk [vmem:[#allocation7 + $0x7] sm:$0x1] %vm542_vm9, %v1981_v4  ;;  %2003 = vst.msk [vmem:[#allocation7 + $0xb] sm:$0x1] %vm542_vm9, %v1989_v6 }
 0x14e   :  { %2005 = vst.msk [vmem:[#allocation7 + $0x13] sm:$0x1] %vm542_vm9, %v1974_v3 }
 0x14f   :  { %v1992_v11 = vcombine.high %v1988_v7, %v1988_v7  ;;  %2004 = vst.msk [vmem:[#allocation7 + $0xf] sm:$0x1] %vm542_vm9, %v1991_v9  ;;  %2006 = vst.msk [vmem:[#allocation7 + $0x17] sm:$0x1] %vm542_vm9, %v1988_v7 }
 0x150   :  { %2007 = vst.msk [vmem:[#allocation7 + $0x1b] sm:$0x1] %vm542_vm9, %v1990_v8 }
 0x151   :  { %2008 = vst.msk [vmem:[#allocation7 + $0x1f] sm:$0x1] %vm542_vm9, %v1992_v11 }
 0x152   :  { %2346 = shalt.err (!%p2343_p6)
}
 0x153   :  { %s2347_s17 = scalar_lea.hbm %s2700_s3, 512 }
 0x154   :  { %p2348_p7 = scmp.ne.s32.totalorder %s2700_s3, %s2347_s17  ;;  %p2351_p8 = scmp.lt.u32.totalorder %s2347_s17, %s2700_s3 }
 0x156   :  { %p2353_p9 = pnand %p2351_p8, %p2348_p7 }
 0x158   :  { %2356 = shalt.err (!%p2353_p9)
}
 0x159   :  { %2020 = dma.vmem_to_hbm [thread:$0]  %s2015_s13, 512, %s2700_s3, [#allocation4], %s2364_s22, %s2364_s22, %s2365_s23  }
 0x15a   :  { %2361 = dma.done.wait [#allocation4], 512  }
 0x15b   :  { %2362 = vsyncadd [#allocation4], 4294966784 }
 0x15c   :  { %2024 = vsyncpa [#allocation3], 1 }
 0x15d   :  { %2025 = vsyncpa [#allocation6], 1 }
 0x15e   :  { %2026 = vsyncpa [#allocation4], 1 }

</bundles_post_ra>
